<compile_context>
chip_gen: v7x
topology: tpu7x:2x2x1
jax: 0.10.0
libtpu: 0.0.40
codegen_flags: <defaults>
</compile_context>

<pallas_src>
import functools

import jax
import jax.numpy as jnp
from jax.experimental import pallas as pl
from jax.experimental.pallas import tpu as pltpu

EPS = 1e-3  # nn.BatchNorm2d(eps=0.001)


# ------------------------------ Pallas kernel -------------------------------

def _act(x, act):
    if act == "relu":
        return jnp.maximum(x, 0.0)
    if act == "elu":  # nn.ELU(alpha=1.0)
        return jnp.where(x > 0.0, x, jnp.expm1(x))
    return x  # identity


def _cat_bn_act_kernel(*args, splits, act):
    # args: x_ref_0 .. x_ref_{k-1}, scale_ref, bias_ref, out_ref
    #   x_ref_i : (1, C_i, t_hw)      one spatial tile of one tuple element
    #   scale   : (C_total, 1)        folded BN scale  (gamma / sqrt(var+eps))
    #   bias    : (C_total, 1)        folded BN bias   (beta - mean*scale)
    #   out     : (1, C_total, t_hw)  concatenated + normalized + activated
    n = len(splits)
    x_refs = args[:n]
    s_ref, b_ref, o_ref = args[n], args[n + 1], args[n + 2]

    off = 0
    for i, c in enumerate(splits):          # static Python loop (unrolled)
        x = x_refs[i][0]                    # (C_i, t_hw), fp32
        s = s_ref[off:off + c, :]           # (C_i, 1) -> broadcast over lanes
        b = b_ref[off:off + c, :]
        y = x * s + b
        o_ref[0, off:off + c, :] = _act(y, act)
        off += c


def _pick_hw_tile(hw):
    # Lane-dense spatial tile: multiple of 128, capped at 512 for VMEM
    # headroom (inputs + output double-buffered).  Fall back to the full
    # spatial extent (block == full dim is always legal) if hw has no
    # 128-multiple divisor (e.g. 7*7=49).
    for cand in (512, 384, 256, 128):
        if hw % cand == 0:
            return cand
    return hw


# ------------------------------ public wrapper ------------------------------

def cat_bn_act(xs, gamma, beta, mean, var, act="relu"):
    """act(BatchNorm2d(cat(xs, dim=1))) for NCHW inputs (PyTorch layout)."""
    if not isinstance(xs, (tuple, list)):
        xs = (xs,)
    xs = [x.astype(jnp.float32) for x in xs]

    N, _, H, W = xs[0].shape
    splits = tuple(int(x.shape[1]) for x in xs)
    C_total = int(sum(splits))
    HW = H * W

    # Fold BN (eval-mode running statistics) into scale/bias.
    scale = (gamma / jnp.sqrt(var + EPS)).astype(jnp.float32)
    bias = (beta - mean * scale).astype(jnp.float32)
    scale2 = scale.reshape(C_total, 1)
    bias2 = bias.reshape(C_total, 1)

    # (N, C_i, H, W) -> (N, C_i, H*W): contiguous merge, no HBM copy.
    xs3 = [x.reshape(N, c, HW) for x, c in zip(xs, splits)]

    t_hw = _pick_hw_tile(HW)
    grid = (N, HW // t_hw)

    # TODO(synk): for very large C_total (>~4k) add a channel grid axis so the
    # (1, C_total, t_hw) output block stays well inside the 32 MiB scoped VMEM.
    in_specs = [
        pl.BlockSpec((1, c, t_hw), lambda n, j: (n, 0, j)) for c in splits
    ] + [
        pl.BlockSpec((C_total, 1), lambda n, j: (0, 0)),
        pl.BlockSpec((C_total, 1), lambda n, j: (0, 0)),
    ]
    out_spec = pl.BlockSpec((1, C_total, t_hw), lambda n, j: (n, 0, j))

    kern = functools.partial(_cat_bn_act_kernel, splits=splits, act=act)
    out = pl.pallas_call(
        kern,
        out_shape=jax.ShapeDtypeStruct((N, C_total, HW), jnp.float32),
        grid=grid,
        in_specs=in_specs,
        out_specs=out_spec,
        compiler_params=pltpu.CompilerParams(
            dimension_semantics=("parallel", "parallel"),
            vmem_limit_bytes=32 * 1024 * 1024,
        ),
    )(*xs3, scale2, bias2)
    return out.reshape(N, C_total, H, W)


# ------------------------------ pure-JAX reference --------------------------

def cat_bn_act_ref(xs, gamma, beta, mean, var, act="relu"):
    x = jnp.concatenate(xs, axis=1) if isinstance(xs, (tuple, list)) else xs
    x = x.astype(jnp.float32)
    scale = gamma / jnp.sqrt(var + EPS)
    bias = beta - mean * scale
    y = x * scale[None, :, None, None] + bias[None, :, None, None]
    return _act(y, act)


# --------------------------------- main --------------------------------------

if __name__ == "__main__":
    key = jax.random.PRNGKey(0)
    k1, k2, k3 = jax.random.split(key, 3)

    # Small, lane-friendly shapes: tuple input -> cat along channels gives 128.
    N, H, W = 2, 16, 16
    c1, c2 = 64, 64
    C = c1 + c2

    x1 = jax.random.normal(k1, (N, c1, H, W), jnp.float32)
    x2 = jax.random.normal(k2, (N, c2, H, W), jnp.float32)

    kb = jax.random.split(k3, 4)
    gamma = jax.random.uniform(kb[0], (C,), jnp.float32, 0.5, 1.5)
    beta = jax.random.normal(kb[1], (C,), jnp.float32) * 0.1
    mean = jax.random.normal(kb[2], (C,), jnp.float32) * 0.1
    var = jax.random.uniform(kb[3], (C,), jnp.float32, 0.5, 1.5)

    # Tuple path (cat + BN + ReLU), fused in one Pallas kernel.
    out = cat_bn_act((x1, x2), gamma, beta, mean, var, act="relu")
    out = jax.block_until_ready(out)
    ref = cat_bn_act_ref((x1, x2), gamma, beta, mean, var, act="relu")
    assert out.shape == (N, C, H, W), out.shape
    assert bool(jnp.all(jnp.isfinite(out)))
    assert bool(jnp.allclose(out, ref, rtol=1e-5, atol=1e-5))

    # Single-tensor path (no cat), ELU activation (as used by DPN's conv5_bn_ac).
    out1 = cat_bn_act(x1, gamma[:c1], beta[:c1], mean[:c1], var[:c1], act="elu")
    out1 = jax.block_until_ready(out1)
    ref1 = cat_bn_act_ref(x1, gamma[:c1], beta[:c1], mean[:c1], var[:c1], act="elu")
    assert out1.shape == (N, c1, H, W), out1.shape
    assert bool(jnp.allclose(out1, ref1, rtol=1e-5, atol=1e-5))

    print("KERNEL_OK")
</pallas_src>

<mosaic_0001>
module attributes {stable_mosaic.version = 11 : i64} {
  func.func @_cat_bn_act_kernel(%arg0: i32, %arg1: i32, %arg2: memref<1x64x256xf32, #tpu.memory_space<vmem>>, %arg3: memref<1x64x256xf32, #tpu.memory_space<vmem>>, %arg4: memref<128x1xf32, #tpu.memory_space<vmem>>, %arg5: memref<128x1xf32, #tpu.memory_space<vmem>>, %arg6: memref<1x128x256xf32, #tpu.memory_space<vmem>>) attributes {dimension_semantics = [#tpu.dimension_semantics<parallel>, #tpu.dimension_semantics<parallel>], iteration_bounds = array<i64: 2, 1>, scalar_prefetch = 0 : i64, scratch_operands = 0 : i64, tpu.core_type = #tpu.core_type<tc>, window_params = [{transform_indices = @transform_0, window_bounds = array<i64: 1, 64, 256>}, {transform_indices = @transform_1, window_bounds = array<i64: 1, 64, 256>}, {pipeline_mode = #tpu.pipeline_mode<synchronous>, transform_indices = @transform_2, window_bounds = array<i64: 128, 1>}, {pipeline_mode = #tpu.pipeline_mode<synchronous>, transform_indices = @transform_3, window_bounds = array<i64: 128, 1>}, {transform_indices = @transform_4, window_bounds = array<i64: 1, 128, 256>}]} {
    %c0 = arith.constant 0 : index
    %c0_0 = arith.constant 0 : index
    %c0_1 = arith.constant 0 : index
    %0 = vector.load %arg2[%c0, %c0_0, %c0_1] : memref<1x64x256xf32, #tpu.memory_space<vmem>>, vector<1x64x256xf32>
    %1 = vector.shape_cast %0 : vector<1x64x256xf32> to vector<64x256xf32>
    %c0_2 = arith.constant 0 : index
    %c0_3 = arith.constant 0 : index
    %2 = vector.load %arg4[%c0_2, %c0_3] : memref<128x1xf32, #tpu.memory_space<vmem>>, vector<64x1xf32>
    %c0_4 = arith.constant 0 : index
    %c0_5 = arith.constant 0 : index
    %3 = vector.load %arg5[%c0_4, %c0_5] : memref<128x1xf32, #tpu.memory_space<vmem>>, vector<64x1xf32>
    %4 = vector.broadcast %2 : vector<64x1xf32> to vector<64x256xf32>
    %5 = arith.mulf %1, %4 : vector<64x256xf32>
    %6 = vector.broadcast %3 : vector<64x1xf32> to vector<64x256xf32>
    %7 = arith.addf %5, %6 : vector<64x256xf32>
    %cst = arith.constant 0.000000e+00 : f32
    %8 = vector.broadcast %cst : f32 to vector<64x256xf32>
    %9 = arith.maximumf %7, %8 : vector<64x256xf32>
    %c0_6 = arith.constant 0 : index
    %c0_7 = arith.constant 0 : index
    %c0_8 = arith.constant 0 : index
    %10 = vector.load %arg6[%c0_6, %c0_7, %c0_8] : memref<1x128x256xf32, #tpu.memory_space<vmem>>, vector<1x64x256xf32>
    %11 = vector.shape_cast %10 : vector<1x64x256xf32> to vector<64x256xf32>
    %12 = vector.shape_cast %9 : vector<64x256xf32> to vector<1x64x256xf32>
    tpu.vector_store %arg6[%c0_6, %c0_7, %c0_8], %12 {strides = array<i32>} : memref<1x128x256xf32, #tpu.memory_space<vmem>>, vector<1x64x256xf32>,
    %c0_9 = arith.constant 0 : index
    %c0_10 = arith.constant 0 : index
    %c0_11 = arith.constant 0 : index
    %13 = vector.load %arg3[%c0_9, %c0_10, %c0_11] : memref<1x64x256xf32, #tpu.memory_space<vmem>>, vector<1x64x256xf32>
    %14 = vector.shape_cast %13 : vector<1x64x256xf32> to vector<64x256xf32>
    %c64 = arith.constant 64 : index
    %c0_12 = arith.constant 0 : index
    %15 = vector.load %arg4[%c64, %c0_12] : memref<128x1xf32, #tpu.memory_space<vmem>>, vector<64x1xf32>
    %c64_13 = arith.constant 64 : index
    %c0_14 = arith.constant 0 : index
    %16 = vector.load %arg5[%c64_13, %c0_14] : memref<128x1xf32, #tpu.memory_space<vmem>>, vector<64x1xf32>
    %17 = vector.broadcast %15 : vector<64x1xf32> to vector<64x256xf32>
    %18 = arith.mulf %14, %17 : vector<64x256xf32>
    %19 = vector.broadcast %16 : vector<64x1xf32> to vector<64x256xf32>
    %20 = arith.addf %18, %19 : vector<64x256xf32>
    %cst_15 = arith.constant 0.000000e+00 : f32
    %21 = vector.broadcast %cst_15 : f32 to vector<64x256xf32>
    %22 = arith.maximumf %20, %21 : vector<64x256xf32>
    %c0_16 = arith.constant 0 : index
    %c64_17 = arith.constant 64 : index
    %c0_18 = arith.constant 0 : index
    %23 = vector.load %arg6[%c0_16, %c64_17, %c0_18] : memref<1x128x256xf32, #tpu.memory_space<vmem>>, vector<1x64x256xf32>
    %24 = vector.shape_cast %23 : vector<1x64x256xf32> to vector<64x256xf32>
    %25 = vector.shape_cast %22 : vector<64x256xf32> to vector<1x64x256xf32>
    tpu.vector_store %arg6[%c0_16, %c64_17, %c0_18], %25 {strides = array<i32>} : memref<1x128x256xf32, #tpu.memory_space<vmem>>, vector<1x64x256xf32>,
    return
  }
  func.func @transform_0(%arg0: i32, %arg1: i32) -> (i32, i32, i32) {
    %c0_i32 = arith.constant 0 : i32
    %c0_i32_0 = arith.constant 0 : i32
    return %arg0, %c0_i32, %arg1 : i32, i32, i32
  }
  func.func @transform_1(%arg0: i32, %arg1: i32) -> (i32, i32, i32) {
    %c0_i32 = arith.constant 0 : i32
    %c0_i32_0 = arith.constant 0 : i32
    return %arg0, %c0_i32, %arg1 : i32, i32, i32
  }
  func.func @transform_2(%arg0: i32, %arg1: i32) -> (i32, i32) {
    %c0_i32 = arith.constant 0 : i32
    %c0_i32_0 = arith.constant 0 : i32
    %c0_i32_1 = arith.constant 0 : i32
    return %c0_i32, %c0_i32_0 : i32, i32
  }
  func.func @transform_3(%arg0: i32, %arg1: i32) -> (i32, i32) {
    %c0_i32 = arith.constant 0 : i32
    %c0_i32_0 = arith.constant 0 : i32
    %c0_i32_1 = arith.constant 0 : i32
    return %c0_i32, %c0_i32_0 : i32, i32
  }
  func.func @transform_4(%arg0: i32, %arg1: i32) -> (i32, i32, i32) {
    %c0_i32 = arith.constant 0 : i32
    %c0_i32_0 = arith.constant 0 : i32
    return %arg0, %c0_i32, %arg1 : i32, i32, i32
  }
}

</mosaic_0001>

<bundles_post_ra>
// kernel: tpu_custom_call.1
= control target key start
LH: loop header
LB: loop body
LE: loop exit
PB: predicated region body
PF: predicated region fallthrough
CT: control target
= control target key end

     0   :  { %9 = vsyncpa [#allocation3], 0  ;;  %s1352_s0 = inlined_call_operand.vmem [shape: f32[2,64,256], index: 0, kind: input, shape index: {}]   ;;  %s1353_s1 = inlined_call_operand.hbm [shape: f32[2,64,256], index: 1, kind: input, shape index: {}]   ;;  %s1354_s2 = inlined_call_operand.vmem [shape: f32[128,1], index: 2, kind: input, shape index: {}]   ;;  %s1355_s3 = inlined_call_operand.vmem [shape: f32[128,1], index: 3, kind: input, shape index: {}]   ;;  %s1356_s4 = inlined_call_operand.hbm [shape: f32[2,128,256], index: 4, kind: output, shape index: {}]  }
   0x1   :  { %11 = vsyncpa [#allocation3 + $0x1], 0 }
   0x2   :  { %12 = vsyncpa [#allocation4], 0 }
   0x3   :  { %14 = vsyncpa [#allocation4 + $0x1], 0  ;;  %s980_s15 = smov 0   ;;  %s982_s16 = smov 0  }
   0x4   :  { %s984_s17 = smov 0   ;;  %s986_s18 = smov 0  }
   0x5   :  { %s988_s19 = smov 0   ;;  %s990_s20 = smov 0  }
   0x6 LB: > { %s745_s21 = sadd.s32 4294967295, %s946_s20   ;;  %s746_s22 = sadd.s32 4294967294, %s946_s20   ;;  %s946_s20 = sphi %s990_s20, %s20_s20   ;;  %s942_s19 = sphi %s988_s19, %s1371_s19   ;;  %s938_s18 = sphi %s986_s18, %s1370_s18   ;;  %s934_s17 = sphi %s984_s17, %s1369_s17   ;;  %s930_s16 = sphi %s982_s16, %s1368_s16   ;;  %s926_s15 = sphi %s980_s15, %s1367_s15  }
   0x7   : > { %s32_s23 = sadd.s32 1, %s942_s19  ;;  %s69_s24 = sadd.s32 1, %s934_s17 }
   0x8   : > { %p34_p0 = scmp.ge.s32.totalorder %s32_s23, 2  ;;  %p76_p1 = scmp.ne.s32.totalorder %s934_s17, %s930_s16 }
   0x9   : > { %p77_p2 = scmp.eq.s32.totalorder %s946_s20, 0  ;;  %p82_p3 = scmp.ne.s32.totalorder %s930_s16, %s926_s15 }
   0xa   : > { %s1373_s23 = smov (%p34_p0, %s32_s23), 0  ;;  %p83_p5 = scmp.eq.s32.totalorder %s745_s21, 0 }
   0xb   : > { %p1021_p4 = por %p77_p2, %p76_p1  ;;  %s64_s26 = ssub.s32 %s942_s19, %s1373_s23 }
   0xc   : > { %p150_p6 = scmp.eq.s32.totalorder %s745_s21, 1  ;;  %p67_p7 = scmp.eq.s32.totalorder %s64_s26, 0 }
   0xd   : > { %p1027_p8 = por %p83_p5, %p82_p3  ;;  %p156_p10 = scmp.eq.s32.totalorder %s746_s22, 1 }
   0xe   : > { %p1031_p9 = por %p150_p6, %p76_p1  ;;  %p777_p13 = scmp.lt.s32.totalorder %s946_s20, 2 }
   0xf   : > { %s1036_s29 = scalar_select %p67_p7, %s934_s17, %s69_s24  }
  0x10   : > { %s1360_s28 = scalar_select %p1031_p9, 1, 0 }
  0x11   : > { %p1038_p11 = por %p156_p10, %p82_p3  ;;  %s195_s5 = sand.u32 1, %s934_s17  }
  0x12   : > { %s749_s6 = sshll.u32 %s195_s5, 7  ;;  %s762_s7 = sshll.u32 %s942_s19, 11 }
  0x13   : > { %s1361_s30 = scalar_select %p1038_p11, 1, 0 }
  0x14   : > { %s1049_s10 = scalar_lea.hbm %s1353_s1, %s762_s7  ;;  %s199_s11 = scalar_lea.vmem [#allocation2], %s749_s6 }
  0x15   : > { %s208_s12 = sshll.u32 %s199_s11, 4  ;;  %p1055_p0 = pnand %p777_p13, %p1021_p4  ;;  %s1051_s12 = int_to_ptr.vmem [resolvable:$true] %s208_s12 }
  0x16   : > { %s1060_s14 = scalar_lea.sflag [#allocation3], %s195_s5  ;;  %s834_s21 = scalar_lea.hbm %s1049_s10, 2048 }
  0x17   : > { %p835_p2 = scmp.ne.s32.totalorder %s1049_s10, %s834_s21  ;;  %p836_p3 = pneg %p1055_p0 }
  0x18   : > { %s839_s25 = scalar_lea.hbm %s1353_s1, 4096  ;;  %p840_p4 = scmp.lt.u32.totalorder %s1049_s10, %s1353_s1 }
  0x19   : > { %p837_p5 = pnand %p836_p3, %p835_p2  ;;  %p841_p7 = scmp.lt.u32.totalorder %s839_s25, %s834_s21 }
  0x1a   : > { %p843_p13 = scmp.lt.u32.totalorder %s834_s21, %s1049_s10 }
  0x1b   : > { %p838_p6 = pneg %p837_p5  ;;  %p842_p10 = por %p841_p7, %p840_p4 }
  0x1d   : > { %p844_p12 = por %p843_p13, %p842_p10 }
  0x1f   : > { %p845_p1 = pnand %p844_p12, %p838_p6 }
  0x21   : > { %848 = shalt.err (!%p845_p1)
}
  0x22   : > { %s849_s5 = scalar_lea.vmem %s1051_s12, 2048  ;;  %s948_s7 = smov [#allocation2]  }
  0x23   : > { %p850_p2 = scmp.ne.s32.totalorder %s1051_s12, %s849_s5  ;;  %s854_s8 = sshll.u32 %s948_s7, 4  ;;  %s855_s8 = int_to_ptr.vmem [resolvable:$false] %s854_s8 }
  0x24   : > { %s856_s9 = scalar_lea.vmem %s855_s8, 4096  ;;  %p857_p9 = scmp.lt.s32.totalorder %s1051_s12, %s855_s8 }
  0x25   : > { %p852_p5 = pnand %p850_p2, %p836_p3  ;;  %p858_p4 = scmp.lt.s32.totalorder %s856_s9, %s849_s5 }
  0x27   : > { %p853_p11 = pneg %p852_p5  ;;  %p859_p7 = por %p858_p4, %p857_p9 }
  0x29   : > { %p860_p10 = pnand %p859_p7, %p853_p11 }
  0x2b   : > { %863 = shalt.err (!%p860_p10)
}
  0x2c   : > { %s949_s11 = smov 256   ;;  %s950_s21 = smov 16  }
  0x2d   : > { %772 = dma.hbm_to_vmem [thread:$0]  (!%p1055_p0), %s1049_s10, 2048, %s1051_s12, %s1060_s14, %s949_s11, %s949_s11, %s950_s21  }
  0x2e   : > { %p216_p12 = scmp.lt.s32.totalorder %s946_s20, 3  ;;  %p1363_p1 = scmp.ge.s32.totalorder %s946_s20, 1 }
  0x30   : > { %p217_p3 = pnand %p1363_p1, %p216_p12 }
  0x31   : > { %s1092_s22 = sand.u32 (!%p217_p3), 1, %s930_s16  }
  0x32   : > { %220 = sbr.rel (%p217_p3) target bundleno = 268 (0x10c), region = 36  ;;  %s753_s24 = sshll.u32 (!%p217_p3), %s1092_s22, 7 }
  0x33   : > { %s223_s25 = scalar_lea.sflag (!%p217_p3), [#allocation3], %s1092_s22  ;;  %s1096_s26 = scalar_lea.vmem (!%p217_p3), [#allocation2], %s753_s24 }
  0x39   : > { %917 = dma.done.wait (%p1027_p8), %s223_s25, 2048  }
  0x3a   : > { %919 = vsyncadd (%p1027_p8), %s223_s25, 4294965248  ;;  %v951_v0 = vmov 0   ;;  %v290_v1 = vld [vmem:[%s1354_s2 + $0x10] sm:$0xff]  ;;  %v288_v2 = vld [vmem:[%s1354_s2] sm:$0xff]  ;;  %p261_p8 = scmp.lt.s32.totalorder %s938_s18, 1  ;;  %s754_s25 = sshll.u32 %s1092_s22, 8 }
  0x3b   : > { %833 = vset.pattern.permute.xlu1 %v951_v0  ;;  %832 = vset.pattern.permute.xlu0 %v951_v0  ;;  %v291_v3 = vld [vmem:[%s1354_s2 + $0x18] sm:$0xff]  ;;  %v289_v4 = vld [vmem:[%s1354_s2 + $0x8] sm:$0xff]  ;;  %v292_v6 = vld [vmem:[%s1354_s2 + $0x20] sm:$0xff]  ;;  %s1222_s10 = scalar_lea.vmem [#allocation5], %s754_s25  ;;  %s625_s6 = scalar_lea.sflag [#allocation4], %s1092_s22 }
  0x3c   : > { %316 = vperm.xlu1 %833, %v290_v1   ;;  %306 = vperm.xlu0 %832, %v288_v2   ;;  %v293_v5 = vld [vmem:[%s1354_s2 + $0x28] sm:$0xff]  ;;  %v295_v7 = vld [vmem:[%s1354_s2 + $0x38] sm:$0xff]  ;;  %v294_v8 = vld [vmem:[%s1354_s2 + $0x30] sm:$0xff]  ;;  %s262_s8 = scalar_select %p261_p8, %s938_s18, 1 }
  0x3d   : > { %v297_v9 = vld [vmem:[%s1355_s3 + $0x8] sm:$0xff]  ;;  %v296_v10 = vld [vmem:[%s1355_s3] sm:$0xff]  ;;  %v299_v11 = vld [vmem:[%s1355_s3 + $0x18] sm:$0xff]  ;;  %s640_s12 = sshll.u32 %s1222_s10, 4  ;;  %p1364_p11 = scmp.ne.s32.totalorder %s1360_s28, 0  ;;  %s1299_s12 = int_to_ptr.vmem [resolvable:$true] %s640_s12 }
  0x3e   : > { %v298_v12 = vld [vmem:[%s1355_s3 + $0x10] sm:$0xff]  ;;  %v301_v13 = vld [vmem:[%s1355_s3 + $0x28] sm:$0xff]  ;;  %v300_v14 = vld [vmem:[%s1355_s3 + $0x20] sm:$0xff]  ;;  %s763_s9 = sshll.u32 %s262_s8, 7  ;;  %s864_s5 = scalar_lea.vmem %s1299_s12, 4096 }
  0x3f   : > { %v465_v15 = vld [vmem:[%s1354_s2 + $0x48] sm:$0xff]  ;;  %v464_v16 = vld [vmem:[%s1354_s2 + $0x40] sm:$0xff]  ;;  %v467_v17 = vld [vmem:[%s1354_s2 + $0x58] sm:$0xff]  ;;  %s1203_s24 = scalar_lea.vmem %s1352_s0, %s763_s9  ;;  %p865_p9 = scmp.ne.s32.totalorder %s1299_s12, %s864_s5 }
  0x40   : > { %321 = vperm.xlu1 %833, %v291_v3   ;;  %311 = vperm.xlu0 %832, %v289_v4   ;;  %v466_v18 = vld [vmem:[%s1354_s2 + $0x50] sm:$0xff]  ;;  %v469_v19 = vld [vmem:[%s1354_s2 + $0x68] sm:$0xff]  ;;  %v468_v20 = vld [vmem:[%s1354_s2 + $0x60] sm:$0xff]  ;;  %s952_s7 = smov [#allocation5]  }
  0x41   : > { %v471_v21 = vld [vmem:[%s1354_s2 + $0x78] sm:$0xff]  ;;  %v470_v22 = vld [vmem:[%s1354_s2 + $0x70] sm:$0xff]  ;;  %v473_v25 = vld [vmem:[%s1355_s3 + $0x48] sm:$0xff]  ;;  %p866_p0 = pnand %p865_p9, %p1364_p11  ;;  %s868_s27 = sshll.u32 %s952_s7, 4  ;;  %s869_s27 = int_to_ptr.vmem [resolvable:$false] %s868_s27 }
  0x42   : > { %v303_v23 = vld [vmem:[%s1355_s3 + $0x38] sm:$0xff]  ;;  %v302_v24 = vld [vmem:[%s1355_s3 + $0x30] sm:$0xff]  ;;  %v472_v26 = vld [vmem:[%s1355_s3 + $0x40] sm:$0xff]  ;;  %s870_s8 = scalar_lea.vmem %s869_s27, 8192  ;;  %p871_p13 = scmp.lt.s32.totalorder %s1299_s12, %s869_s27 }
  0x43   : > { %v475_v27 = vld [vmem:[%s1355_s3 + $0x58] sm:$0xff]  ;;  %v474_v28 = vld [vmem:[%s1355_s3 + $0x50] sm:$0xff]  ;;  %v477_v29 = vld [vmem:[%s1355_s3 + $0x68] sm:$0xff]  ;;  %p867_p6 = pneg %p866_p0  ;;  %p872_p2 = scmp.lt.s32.totalorder %s870_s8, %s864_s5 }
  0x44   : > { %331 = vperm.xlu1 %833, %v293_v5   ;;  %326 = vperm.xlu0 %832, %v292_v6   ;;  %v476_v30 = vld [vmem:[%s1355_s3 + $0x60] sm:$0xff]  ;;  %v479_v31 = vld [vmem:[%s1355_s3 + $0x78] sm:$0xff]  ;;  %v478_v32 = vld [vmem:[%s1355_s3 + $0x70] sm:$0xff] }
  0x45   : > { %v272_v39 = vld [vmem:[%s1203_s24] sm:$0xff]  ;;  %v273_v40 = vld [vmem:[%s1203_s24 + $0x8] sm:$0xff]  ;;  %v274_v41 = vld [vmem:[%s1203_s24 + $0x10] sm:$0xff]  ;;  %p873_p5 = por %p872_p2, %p871_p13 }
  0x46   : > { %v275_v42 = vld [vmem:[%s1203_s24 + $0x18] sm:$0xff]  ;;  %v276_v45 = vld [vmem:[%s1203_s24 + $0x20] sm:$0xff]  ;;  %v277_v46 = vld [vmem:[%s1203_s24 + $0x28] sm:$0xff] }
  0x47   : > { %v278_v49 = vld [vmem:[%s1203_s24 + $0x30] sm:$0xff]  ;;  %v279_v50 = vld [vmem:[%s1203_s24 + $0x38] sm:$0xff]  ;;  %v280_v1 = vld [vmem:[%s1203_s24 + $0x40] sm:$0xff]  ;;  %p874_p4 = pnand %p873_p5, %p867_p6 }
  0x48   : > { %341 = vperm.xlu1 %833, %v295_v7   ;;  %336 = vperm.xlu0 %832, %v294_v8   ;;  %v282_v63 = vld [vmem:[%s1203_s24 + $0x50] sm:$0xff]  ;;  %v283_v0 = vld [vmem:[%s1203_s24 + $0x58] sm:$0xff]  ;;  %v281_v2 = vld [vmem:[%s1203_s24 + $0x48] sm:$0xff] }
  0x4c   : > { %367 = vperm.xlu1 %833, %v297_v9   ;;  %362 = vperm.xlu0 %832, %v296_v10  }
  0x50   : > { %377 = vperm.xlu1 %833, %v299_v11   ;;  %372 = vperm.xlu0 %832, %v298_v12  }
  0x54   : > { %387 = vperm.xlu1 %833, %v301_v13   ;;  %382 = vperm.xlu0 %832, %v300_v14  }
  0x58   : > { %487 = vperm.xlu1 %833, %v465_v15   ;;  %482 = vperm.xlu0 %832, %v464_v16  }
  0x5c   : > { %497 = vperm.xlu1 %833, %v467_v17   ;;  %492 = vperm.xlu0 %832, %v466_v18  }
  0x60   : > { %507 = vperm.xlu1 %833, %v469_v19   ;;  %502 = vperm.xlu0 %832, %v468_v20  }
  0x64   : > { %517 = vperm.xlu1 %833, %v471_v21   ;;  %512 = vperm.xlu0 %832, %v470_v22  }
  0x68   : > { %397 = vperm.xlu1 %833, %v303_v23   ;;  %392 = vperm.xlu0 %832, %v302_v24  }
  0x6c   : > { %543 = vperm.xlu1 %833, %v473_v25   ;;  %538 = vperm.xlu0 %832, %v472_v26  }
  0x70   : > { %553 = vperm.xlu1 %833, %v475_v27   ;;  %548 = vperm.xlu0 %832, %v474_v28  }
  0x74   : > { %563 = vperm.xlu1 %833, %v477_v29   ;;  %558 = vperm.xlu0 %832, %v476_v30  }
  0x78   : > { %573 = vperm.xlu1 %833, %v479_v31   ;;  %568 = vperm.xlu0 %832, %v478_v32  }
  0xbb   : > { %v317_v33 = vpop.permute.xlu1 %316  ;;  %v307_v34 = vpop.permute.xlu0 %306 }
  0xbc   : > { %v344_v47 = vmul.f32 %v307_v34, %v272_v39  ;;  %v345_v48 = vmul.f32 %v307_v34, %v273_v40  ;;  %v348_v59 = vmul.f32 %v317_v33, %v276_v45  ;;  %v349_v60 = vmul.f32 %v317_v33, %v277_v46  ;;  %v284_v39 = vld [vmem:[%s1203_s24 + $0x60] sm:$0xff]  ;;  %v285_v40 = vld [vmem:[%s1203_s24 + $0x68] sm:$0xff]  ;;  %v450_v45 = vld [vmem:[%s1096_s26 + $0x10] sm:$0xff] }
  0xbf   : > { %v322_v35 = vpop.permute.xlu1 %321  ;;  %v312_v36 = vpop.permute.xlu0 %311 }
  0xc0   : > { %v346_v51 = vmul.f32 %v312_v36, %v274_v41  ;;  %v347_v52 = vmul.f32 %v312_v36, %v275_v42  ;;  %v350_v61 = vmul.f32 %v322_v35, %v278_v49  ;;  %v351_v62 = vmul.f32 %v322_v35, %v279_v50  ;;  %v451_v50 = vld [vmem:[%s1096_s26 + $0x18] sm:$0xff] }
  0xc3   : > { %v332_v37 = vpop.permute.xlu1 %331  ;;  %v327_v38 = vpop.permute.xlu0 %326 }
  0xc4   : > { %v354_v13 = vmul.f32 %v332_v37, %v282_v63  ;;  %v355_v14 = vmul.f32 %v332_v37, %v283_v0  ;;  %v352_v15 = vmul.f32 %v327_v38, %v280_v1  ;;  %v353_v16 = vmul.f32 %v327_v38, %v281_v2  ;;  %v286_v37 = vld [vmem:[%s1203_s24 + $0x70] sm:$0xff]  ;;  %v287_v38 = vld [vmem:[%s1203_s24 + $0x78] sm:$0xff]  ;;  %v452_v63 = vld [vmem:[%s1096_s26 + $0x20] sm:$0xff] }
  0xc5   : > { %v453_v0 = vld [vmem:[%s1096_s26 + $0x28] sm:$0xff] }
  0xc7   : > { %v1209_v43 = vpop.permute.xlu1 %341  ;;  %v1211_v44 = vpop.permute.xlu0 %336 }
  0xc8   : > { %v358_v46 = vmul.f32 %v1209_v43, %v286_v37  ;;  %v357_v49 = vmul.f32 %v1211_v44, %v285_v40  ;;  %v460_v37 = vld [vmem:[%s1096_s26 + $0x60] sm:$0xff] }
  0xcb   : > { %v368_v53 = vpop.permute.xlu1 %367  ;;  %v363_v54 = vpop.permute.xlu0 %362 }
  0xcc   : > { %v402_v55 = vadd.f32 %v368_v53, %v346_v51  ;;  %v403_v56 = vadd.f32 %v368_v53, %v347_v52  ;;  %v400_v57 = vadd.f32 %v363_v54, %v344_v47  ;;  %v401_v58 = vadd.f32 %v363_v54, %v345_v48  ;;  %v448_v51 = vld [vmem:[%s1096_s26] sm:$0xff]  ;;  %v449_v52 = vld [vmem:[%s1096_s26 + $0x8] sm:$0xff] }
  0xcd   : > { %v359_v47 = vmul.f32 %v1209_v43, %v287_v38  ;;  %v356_v48 = vmul.f32 %v1211_v44, %v284_v39  ;;  %v454_v44 = vld [vmem:[%s1096_s26 + $0x30] sm:$0xff]  ;;  %v461_v38 = vld [vmem:[%s1096_s26 + $0x68] sm:$0xff] }
  0xce   : > { %v418_v3 = vmax.f32 %v402_v55, 0.0  ;;  %v419_v4 = vmax.f32 %v403_v56, 0.0  ;;  %v416_v5 = vmax.f32 %v400_v57, 0.0  ;;  %v417_v6 = vmax.f32 %v401_v58, 0.0 }
  0xcf   : > { %v378_v7 = vpop.permute.xlu1 %377  ;;  %v373_v8 = vpop.permute.xlu0 %372 }
  0xd0   : > { %434 = vst [vmem:[%s1222_s10 + $0x10] sm:$0xff] %v418_v3  ;;  %435 = vst [vmem:[%s1222_s10 + $0x18] sm:$0xff] %v419_v4  ;;  %v406_v9 = vadd.f32 %v378_v7, %v350_v61  ;;  %v407_v10 = vadd.f32 %v378_v7, %v351_v62  ;;  %v404_v11 = vadd.f32 %v373_v8, %v348_v59  ;;  %v455_v62 = vld [vmem:[%s1096_s26 + $0x38] sm:$0xff] }
  0xd1   : > { %432 = vst [vmem:[%s1222_s10] sm:$0xff] %v416_v5  ;;  %433 = vst [vmem:[%s1222_s10 + $0x8] sm:$0xff] %v417_v6  ;;  %v405_v12 = vadd.f32 %v373_v8, %v349_v60 }
  0xd2   : > { %v422_v17 = vmax.f32 %v406_v9, 0.0  ;;  %v423_v18 = vmax.f32 %v407_v10, 0.0  ;;  %v420_v19 = vmax.f32 %v404_v11, 0.0 }
  0xd3   : > { %v421_v20 = vmax.f32 %v405_v12, 0.0  ;;  %v388_v21 = vpop.permute.xlu1 %387  ;;  %v383_v22 = vpop.permute.xlu0 %382 }
  0xd4   : > { %438 = vst [vmem:[%s1222_s10 + $0x30] sm:$0xff] %v422_v17  ;;  %439 = vst [vmem:[%s1222_s10 + $0x38] sm:$0xff] %v423_v18  ;;  %v410_v23 = vadd.f32 %v388_v21, %v354_v13  ;;  %v411_v24 = vadd.f32 %v388_v21, %v355_v14  ;;  %v408_v25 = vadd.f32 %v383_v22, %v352_v15  ;;  %v458_v15 = vld [vmem:[%s1096_s26 + $0x50] sm:$0xff]  ;;  %v456_v17 = vld [vmem:[%s1096_s26 + $0x40] sm:$0xff] }
  0xd5   : > { %436 = vst [vmem:[%s1222_s10 + $0x20] sm:$0xff] %v420_v19  ;;  %437 = vst [vmem:[%s1222_s10 + $0x28] sm:$0xff] %v421_v20  ;;  %v409_v26 = vadd.f32 %v383_v22, %v353_v16  ;;  %v459_v16 = vld [vmem:[%s1096_s26 + $0x58] sm:$0xff]  ;;  %v457_v18 = vld [vmem:[%s1096_s26 + $0x48] sm:$0xff] }
  0xd6   : > { %v426_v27 = vmax.f32 %v410_v23, 0.0  ;;  %v427_v28 = vmax.f32 %v411_v24, 0.0  ;;  %v424_v29 = vmax.f32 %v408_v25, 0.0 }
  0xd7   : > { %v425_v30 = vmax.f32 %v409_v26, 0.0  ;;  %v488_v31 = vpop.permute.xlu1 %487  ;;  %v483_v32 = vpop.permute.xlu0 %482 }
  0xd8   : > { %442 = vst [vmem:[%s1222_s10 + $0x50] sm:$0xff] %v426_v27  ;;  %443 = vst [vmem:[%s1222_s10 + $0x58] sm:$0xff] %v427_v28  ;;  %v522_v43 = vmul.f32 %v488_v31, %v450_v45  ;;  %v523_v59 = vmul.f32 %v488_v31, %v451_v50  ;;  %v520_v60 = vmul.f32 %v483_v32, %v448_v51 }
  0xd9   : > { %440 = vst [vmem:[%s1222_s10 + $0x40] sm:$0xff] %v424_v29  ;;  %441 = vst [vmem:[%s1222_s10 + $0x48] sm:$0xff] %v425_v30  ;;  %v521_v61 = vmul.f32 %v483_v32, %v449_v52 }
  0xdb   : > { %v498_v33 = vpop.permute.xlu1 %497  ;;  %v493_v34 = vpop.permute.xlu0 %492 }
  0xdc   : > { %v526_v11 = vmul.f32 %v498_v33, %v454_v44  ;;  %v527_v12 = vmul.f32 %v498_v33, %v455_v62  ;;  %v524_v13 = vmul.f32 %v493_v34, %v452_v63  ;;  %v525_v14 = vmul.f32 %v493_v34, %v453_v0  ;;  %v462_v33 = vld [vmem:[%s1096_s26 + $0x70] sm:$0xff]  ;;  %v463_v34 = vld [vmem:[%s1096_s26 + $0x78] sm:$0xff]  ;;  %s764_s26 = sshll.u32 %s938_s18, 12 }
  0xdd   : > { %s1297_s18 = scalar_lea.hbm %s1356_s4, %s764_s26 }
  0xdf   : > { %v1236_v35 = vpop.permute.xlu1 %507  ;;  %v1238_v36 = vpop.permute.xlu0 %502 }
  0xe0   : > { %v530_v29 = vmul.f32 %v1236_v35, %v458_v15  ;;  %v531_v30 = vmul.f32 %v1236_v35, %v459_v16  ;;  %v528_v31 = vmul.f32 %v1238_v36, %v456_v17  ;;  %v529_v32 = vmul.f32 %v1238_v36, %v457_v18 }
  0xe3   : > { %v1244_v41 = vpop.permute.xlu1 %517  ;;  %v1246_v42 = vpop.permute.xlu0 %512 }
  0xe4   : > { %v534_v51 = vmul.f32 %v1244_v41, %v462_v33  ;;  %v535_v52 = vmul.f32 %v1244_v41, %v463_v34 }
  0xe7   : > { %v398_v53 = vpop.permute.xlu1 %397  ;;  %v393_v54 = vpop.permute.xlu0 %392 }
  0xe8   : > { %v414_v55 = vadd.f32 %v398_v53, %v358_v46  ;;  %v415_v56 = vadd.f32 %v398_v53, %v359_v47  ;;  %v412_v57 = vadd.f32 %v393_v54, %v356_v48  ;;  %v413_v58 = vadd.f32 %v393_v54, %v357_v49 }
  0xe9   : > { %v532_v53 = vmul.f32 %v1246_v42, %v460_v37  ;;  %v533_v54 = vmul.f32 %v1246_v42, %v461_v38 }
  0xea   : > { %v430_v1 = vmax.f32 %v414_v55, 0.0  ;;  %v431_v2 = vmax.f32 %v415_v56, 0.0  ;;  %v428_v3 = vmax.f32 %v412_v57, 0.0  ;;  %v429_v4 = vmax.f32 %v413_v58, 0.0 }
  0xeb   : > { %v544_v5 = vpop.permute.xlu1 %543  ;;  %v539_v6 = vpop.permute.xlu0 %538 }
  0xec   : > { %446 = vst [vmem:[%s1222_s10 + $0x70] sm:$0xff] %v430_v1  ;;  %447 = vst [vmem:[%s1222_s10 + $0x78] sm:$0xff] %v431_v2  ;;  %v578_v7 = vadd.f32 %v544_v5, %v522_v43  ;;  %v579_v8 = vadd.f32 %v544_v5, %v523_v59  ;;  %v576_v9 = vadd.f32 %v539_v6, %v520_v60 }
  0xed   : > { %444 = vst [vmem:[%s1222_s10 + $0x60] sm:$0xff] %v428_v3  ;;  %445 = vst [vmem:[%s1222_s10 + $0x68] sm:$0xff] %v429_v4  ;;  %v577_v10 = vadd.f32 %v539_v6, %v521_v61 }
  0xee   : > { %v594_v19 = vmax.f32 %v578_v7, 0.0  ;;  %v595_v20 = vmax.f32 %v579_v8, 0.0  ;;  %v592_v21 = vmax.f32 %v576_v9, 0.0 }
  0xef   : > { %v593_v22 = vmax.f32 %v577_v10, 0.0  ;;  %v554_v23 = vpop.permute.xlu1 %553  ;;  %v549_v24 = vpop.permute.xlu0 %548 }
  0xf0   : > { %610 = vst [vmem:[%s1222_s10 + $0x90] sm:$0xff] %v594_v19  ;;  %611 = vst [vmem:[%s1222_s10 + $0x98] sm:$0xff] %v595_v20  ;;  %v582_v25 = vadd.f32 %v554_v23, %v526_v11  ;;  %v583_v26 = vadd.f32 %v554_v23, %v527_v12  ;;  %v580_v27 = vadd.f32 %v549_v24, %v524_v13 }
  0xf1   : > { %608 = vst [vmem:[%s1222_s10 + $0x80] sm:$0xff] %v592_v21  ;;  %609 = vst [vmem:[%s1222_s10 + $0x88] sm:$0xff] %v593_v22  ;;  %v581_v28 = vadd.f32 %v549_v24, %v525_v14 }
  0xf2   : > { %v598_v39 = vmax.f32 %v582_v25, 0.0  ;;  %v599_v40 = vmax.f32 %v583_v26, 0.0  ;;  %v596_v45 = vmax.f32 %v580_v27, 0.0 }
  0xf3   : > { %v597_v46 = vmax.f32 %v581_v28, 0.0  ;;  %v564_v47 = vpop.permute.xlu1 %563  ;;  %v559_v48 = vpop.permute.xlu0 %558 }
  0xf4   : > { %614 = vst [vmem:[%s1222_s10 + $0xb0] sm:$0xff] %v598_v39  ;;  %615 = vst [vmem:[%s1222_s10 + $0xb8] sm:$0xff] %v599_v40  ;;  %v586_v35 = vadd.f32 %v564_v47, %v530_v29  ;;  %v587_v49 = vadd.f32 %v564_v47, %v531_v30  ;;  %v584_v36 = vadd.f32 %v559_v48, %v528_v31 }
  0xf5   : > { %612 = vst [vmem:[%s1222_s10 + $0xa0] sm:$0xff] %v596_v45  ;;  %613 = vst [vmem:[%s1222_s10 + $0xa8] sm:$0xff] %v597_v46  ;;  %v585_v50 = vadd.f32 %v559_v48, %v529_v32 }
  0xf6   : > { %v602_v55 = vmax.f32 %v586_v35, 0.0  ;;  %v603_v56 = vmax.f32 %v587_v49, 0.0  ;;  %v600_v57 = vmax.f32 %v584_v36, 0.0 }
  0xf7   : > { %v601_v58 = vmax.f32 %v585_v50, 0.0  ;;  %v574_v43 = vpop.permute.xlu1 %573  ;;  %v569_v59 = vpop.permute.xlu0 %568 }
  0xf8   : > { %618 = vst [vmem:[%s1222_s10 + $0xd0] sm:$0xff] %v602_v55  ;;  %619 = vst [vmem:[%s1222_s10 + $0xd8] sm:$0xff] %v603_v56  ;;  %v590_v41 = vadd.f32 %v574_v43, %v534_v51  ;;  %v591_v60 = vadd.f32 %v574_v43, %v535_v52  ;;  %v588_v42 = vadd.f32 %v569_v59, %v532_v53 }
  0xf9   : > { %616 = vst [vmem:[%s1222_s10 + $0xc0] sm:$0xff] %v600_v57  ;;  %617 = vst [vmem:[%s1222_s10 + $0xc8] sm:$0xff] %v601_v58  ;;  %v589_v61 = vadd.f32 %v569_v59, %v533_v54 }
  0xfa   : > { %v606_v44 = vmax.f32 %v590_v41, 0.0  ;;  %v607_v62 = vmax.f32 %v591_v60, 0.0  ;;  %v604_v63 = vmax.f32 %v588_v42, 0.0 }
  0xfb   : > { %v605_v0 = vmax.f32 %v589_v61, 0.0 }
  0xfc   : > { %622 = vst [vmem:[%s1222_s10 + $0xf0] sm:$0xff] %v606_v44  ;;  %623 = vst [vmem:[%s1222_s10 + $0xf8] sm:$0xff] %v607_v62 }
  0xfd   : > { %620 = vst [vmem:[%s1222_s10 + $0xe0] sm:$0xff] %v604_v63  ;;  %621 = vst [vmem:[%s1222_s10 + $0xe8] sm:$0xff] %v605_v0 }
  0xfe   : > { %877 = shalt.err (!%p874_p4)
}
  0xff   : > { %s878_s9 = scalar_lea.hbm %s1297_s18, 4096  ;;  %s882_s24 = scalar_lea.hbm %s1356_s4, 8192 }
 0x100   : > { %p879_p7 = scmp.ne.s32.totalorder %s1297_s18, %s878_s9  ;;  %p883_p1 = scmp.lt.u32.totalorder %s1297_s18, %s1356_s4 }
 0x101   : > { %p884_p3 = scmp.lt.u32.totalorder %s882_s24, %s878_s9  ;;  %p886_p9 = scmp.lt.u32.totalorder %s878_s9, %s1297_s18 }
 0x102   : > { %p880_p10 = pnand %p879_p7, %p1364_p11 }
 0x103   : > { %p885_p8 = por %p884_p3, %p883_p1 }
 0x104   : > { %p881_p12 = pneg %p880_p10 }
 0x105   : > { %p887_p0 = por %p886_p9, %p885_p8 }
 0x107   : > { %p888_p6 = pnand %p887_p0, %p881_p12 }
 0x109   : > { %891 = shalt.err (!%p888_p6)
}
 0x10a   : > { %s953_s26 = smov 256   ;;  %s954_s13 = smov 16  }
 0x10b   : > { %767 = dma.vmem_to_hbm [thread:$0]  (%p1364_p11), %s1299_s12, 4096, %s1297_s18, %s625_s6, %s953_s26, %s953_s26, %s954_s13  }
 0x10c PF: > { %s655_s14 = sand.u32 1, %s926_s15   ;;  %p1365_p13 = scmp.ne.s32.totalorder %s1361_s30, 0 }
 0x10d   : > { %p1366_p2 = scmp.ge.s32.totalorder %s946_s20, 2  ;;  %s656_s5 = scalar_lea.sflag [#allocation4], %s655_s14 }
 0x10f   : > { %p774_p5 = pnand %p1366_p2, %p1365_p13 }
 0x111   : > { %921 = dma.done.wait (!%p774_p5), %s656_s5, 4096  }
 0x112   : > { %923 = vsyncadd (!%p774_p5), %s656_s5, 4294963200  ;;  %s20_s20 = sadd.s32 1, %s946_s20   ;;  %s1367_s15 = smov %s930_s16 }
 0x113   : > { %p17_p4 = scmp.ge.s32.totalorder %s20_s20, 4   ;;  %s1368_s16 = smov %s934_s17 }
 0x114   : > { %s1369_s17 = smov %s1036_s29  ;;  %s1370_s18 = smov %s942_s19 }
 0x115   : > { %s1371_s19 = smov %s1373_s23  ;;  %19 = sbr.rel (!%p17_p4) target bundleno = 6 (0x6), region = 84 }
 0x11c   :  { %661 = vsyncpa [#allocation3], 1 }
 0x11d   :  { %663 = vsyncpa [#allocation3 + $0x1], 1 }
 0x11e   :  { %664 = vsyncpa [#allocation4], 1 }
 0x11f   :  { %666 = vsyncpa [#allocation4 + $0x1], 1 }

</bundles_post_ra>
